<compile_context>
chip_gen: v7x
topology: tpu7x:2x2x1
jax: 0.10.0
libtpu: 0.0.40
codegen_flags: <defaults>
</compile_context>

<pallas_src>
import jax
import jax.numpy as jnp
from jax.experimental import pallas as pl
from jax.experimental.pallas import tpu as pltpu

# ---- GAT default hyper-parameters (match the PyTorch module defaults) ----
HIDDEN_FEATS = (32, 32)          # per-head output size of each layer
NUM_HEADS = (4, 4)
AGG_MODES = ("flatten", "mean")
ACTIVATIONS = ("elu", None)
NEG_SLOPE = 0.2                  # LeakyReLU alpha

_NEG_INF = -1e30                 # finite mask value (avoids inf-inf NaNs)


def _pick_block(n_pad, max_block=512):
    """Largest multiple of 8 <= max_block that evenly divides n_pad."""
    b = min(max_block, n_pad)
    b -= b % 8
    while n_pad % b:
        b -= 8
    return b


# --------------------------------------------------------------------------
# Phase 1: node-parallel projection   z = x W,  [el | er] = z [AL | AR]
# --------------------------------------------------------------------------
def _project_kernel(x_ref, w_ref, alr_ref, z_ref, elr_ref):
    z = jnp.dot(x_ref[...], w_ref[...], preferred_element_type=jnp.float32)
    z_ref[...] = z
    # ALR = [AL | AR] is a (H*D, 2H) head-selection matrix: one fused MXU matmul.
    elr_ref[...] = jnp.dot(z, alr_ref[...], preferred_element_type=jnp.float32)


# --------------------------------------------------------------------------
# Phase 2: per destination-node tile: masked edge-softmax + aggregation
# --------------------------------------------------------------------------
def _make_attend_kernel(*, num_heads, head_dim, neg_slope, activation,
                        identity_residual, emit_att):
    def kernel(*refs):
        er_ref, x_ref, adjt_ref, elt_ref, zbd_ref = refs[:5]
        i = 5
        if identity_residual:
            resw_ref = None
        else:
            resw_ref = refs[i]; i += 1
        b_ref = refs[i]; i += 1
        o_ref = refs[i]; i += 1
        att_ref = refs[i] if emit_att else None

        er = er_ref[...]                                   # (T, H)   dst terms
        elt = elt_ref[...]                                 # (H, N)   src terms
        # int8 adjacency is a storage/DMA format only: cast once, compare in f32.
        mask = adjt_ref[...].astype(jnp.float32) > 0.0     # (T, N)   adj^T tile

        if identity_residual:                              # DGL: Identity if in == H*D
            res = x_ref[...]                               # (T, H*D)
        else:
            res = jnp.dot(x_ref[...], resw_ref[...],
                          preferred_element_type=jnp.float32)

        alphas = []
        for h in range(num_heads):
            # attention logits for every (dst in tile, src) pair of this head
            e = er[:, h:h + 1] + elt[h:h + 1, :]           # (T, N)
            e = jnp.where(e > 0, e, neg_slope * e)         # LeakyReLU
            e = jnp.where(mask, e, _NEG_INF)               # mask non-edges
            m = jnp.max(e, axis=-1, keepdims=True)         # per-dst max
            p = jnp.where(mask, jnp.exp(e - m), 0.0)
            s = jnp.sum(p, axis=-1, keepdims=True)
            inv = pl.reciprocal(jnp.where(s > 0, s, 1.0), approx=True)   # EUP slot
            alpha = p * inv                                # edge softmax
            alphas.append(alpha)
            if emit_att:
                att_ref[h, :, :] = alpha                   # dense attention (last layer)

        # One batched MXU matmul against the block-diagonal z:
        #   (T, H*N) @ (H*N, H*D) -> (T, H*D), full 128 lane-dense output columns.
        alpha_cat = jnp.concatenate(alphas, axis=-1)       # (T, H*N)
        out = jnp.dot(alpha_cat, zbd_ref[...],
                      preferred_element_type=jnp.float32)  # (T, H*D)
        out = out + res + b_ref[...]

        if activation == "elu":                            # only for 'flatten' layers
            out = jnp.where(out > 0, out, jnp.exp(out) - 1.0)

        o_ref[...] = out                                   # lane-dense (T, H*D) store

    return kernel


# --------------------------------------------------------------------------
# Per-layer wrapper: two pallas_calls (projection, attention+aggregate)
# --------------------------------------------------------------------------
def _gat_layer(feats, adj_t_i8, p, *, agg_mode, activation, block_n, emit_att):
    n_pad, f_in = feats.shape
    heads, head_dim = p["attn_l"].shape
    hd = heads * head_dim
    identity_residual = p["res_identity"]

    # ---------------- phase 1: projection (large row tiles) ----------------
    block_proj = _pick_block(n_pad, max_block=512)
    z, elr = pl.pallas_call(
        _project_kernel,
        out_shape=(
            jax.ShapeDtypeStruct((n_pad, hd), jnp.float32),
            jax.ShapeDtypeStruct((n_pad, 2 * heads), jnp.float32),
        ),
        grid_spec=pltpu.PrefetchScalarGridSpec(
            num_scalar_prefetch=0,
            grid=(n_pad // block_proj,),
            in_specs=[
                pl.BlockSpec((block_proj, f_in), lambda i: (i, 0)),   # x row tile
                pl.BlockSpec((f_in, hd), lambda i: (0, 0)),           # W (resident)
                pl.BlockSpec((hd, 2 * heads), lambda i: (0, 0)),      # [AL|AR] (resident)
            ],
            out_specs=(
                pl.BlockSpec((block_proj, hd), lambda i: (i, 0)),
                pl.BlockSpec((block_proj, 2 * heads), lambda i: (i, 0)),
            ),
        ),
        compiler_params=pltpu.CompilerParams(
            dimension_semantics=("parallel",)),
    )(feats, p["w"], p["alr_sel"])

    # Tiny XLA glue (a few KiB): split el/er, transpose el, build block-diag z.
    el_t = elr[:, :heads].T                   # (H, N): lane-dense source logits
    er = elr[:, heads:]                       # (N, H): destination logits
    z_heads = z.reshape(n_pad, heads, head_dim)
    z_bd = (z_heads.transpose(1, 0, 2)[:, :, None, :]
            * jnp.eye(heads, dtype=z.dtype)[:, None, :, None]
            ).reshape(heads * n_pad, hd)      # block-diagonal (H*N, H*D)

    # ---------------- phase 2: attention + aggregation ----------------
    kernel = _make_attend_kernel(
        num_heads=heads, head_dim=head_dim, neg_slope=NEG_SLOPE,
        activation=(activation if agg_mode == "flatten" else None),
        identity_residual=identity_residual, emit_att=emit_att)

    in_specs = [
        pl.BlockSpec((block_n, heads), lambda j: (j, 0)),        # er (dst tile)
        pl.BlockSpec((block_n, f_in), lambda j: (j, 0)),         # x  (dst tile, residual)
        pl.BlockSpec((block_n, n_pad), lambda j: (j, 0)),        # adj^T int8 (dst tile)
        pl.BlockSpec((heads, n_pad), lambda j: (0, 0)),          # el^T (resident)
        pl.BlockSpec((heads * n_pad, hd), lambda j: (0, 0)),     # z block-diag (resident)
    ]
    args = [er, feats, adj_t_i8, el_t, z_bd]
    if not identity_residual:
        in_specs.append(pl.BlockSpec((f_in, hd), lambda j: (0, 0)))   # W_res (resident)
        args.append(p["res_w"])
    in_specs.append(pl.BlockSpec((1, hd), lambda j: (0, 0)))          # bias (resident)
    args.append(p["bias"])

    out_shape = [jax.ShapeDtypeStruct((n_pad, hd), jnp.float32)]
    out_specs = [pl.BlockSpec((block_n, hd), lambda j: (j, 0))]
    if emit_att:
        out_shape.append(jax.ShapeDtypeStruct((heads, n_pad, n_pad), jnp.float32))
        out_specs.append(pl.BlockSpec((heads, block_n, n_pad), lambda j: (0, j, 0)))

    cost = pl.CostEstimate(
        flops=int(2 * n_pad * (heads * n_pad) * hd
                  + (0 if identity_residual else 2 * n_pad * f_in * hd)
                  + 10 * heads * n_pad * n_pad),
        transcendentals=int(heads * n_pad * n_pad),
        bytes_accessed=int(
            n_pad * n_pad                                        # int8 adj^T
            + 4 * (n_pad * (2 * heads + f_in + hd)
                   + heads * n_pad + heads * n_pad * hd + hd
                   + (heads * n_pad * n_pad if emit_att else 0)
                   + (0 if identity_residual else f_in * hd))),
    )

    outs = pl.pallas_call(
        kernel,
        out_shape=tuple(out_shape),
        grid_spec=pltpu.PrefetchScalarGridSpec(
            num_scalar_prefetch=0,
            grid=(n_pad // block_n,),
            in_specs=in_specs,
            out_specs=tuple(out_specs),
        ),
        compiler_params=pltpu.CompilerParams(
            dimension_semantics=("parallel",)),
        cost_estimate=cost,
    )(*args)

    if emit_att:
        flat, att = outs
    else:
        (flat,) = outs
        att = None

    if agg_mode == "flatten":
        feats_out = flat
    else:
        # Lane-dense (N, H*D) kernel output; cheap head-mean epilogue in XLA.
        feats_out = flat.reshape(n_pad, heads, head_dim).mean(axis=1)
        if activation == "elu":
            feats_out = jnp.where(feats_out > 0, feats_out, jnp.exp(feats_out) - 1.0)
    return feats_out, att


def gat_forward(x, adj, params, *, block_n=128):
    """Dense GAT forward (eval mode).

    x:   (N, in_feats) float32 node features
    adj: (N, N), adj[u, v] != 0 iff directed edge u -> v (add self-loops as usual)
    Returns:
      feats: (N, HIDDEN_FEATS[-1])   (last layer uses agg_mode='mean')
      att:   (NUM_HEADS[-1], N, N)   last-layer attention, att[h, v, u] = weight of
                                     edge u -> v for head h (0 for non-edges)
    """
    n = x.shape[0]
    assert block_n % 8 == 0
    n_pad = ((n + block_n - 1) // block_n) * block_n
    pad = n_pad - n
    x_p = jnp.pad(x.astype(jnp.float32), ((0, pad), (0, 0)))
    # int8 adjacency: 4x smaller DMA stream; the >0 compare stays in-kernel.
    adj_t_i8 = jnp.pad((adj != 0).astype(jnp.int8).T, ((0, pad), (0, pad)))

    feats, att = x_p, None
    n_layers = len(params)
    for i, p in enumerate(params):
        feats, att_i = _gat_layer(feats, adj_t_i8, p,
                                  agg_mode=AGG_MODES[i],
                                  activation=ACTIVATIONS[i],
                                  block_n=block_n,
                                  emit_att=(i == n_layers - 1))
        if att_i is not None:
            att = att_i
    return feats[:n], att[:, :n, :n]


# --------------------------------------------------------------------------
# Parameters & pure-JAX reference (mirrors DGL GATConv semantics densely)
# --------------------------------------------------------------------------
def init_params(key, in_feats):
    params = []
    for i, (hid, heads) in enumerate(zip(HIDDEN_FEATS, NUM_HEADS)):
        key, kw, kl, kr, krw, kb = jax.random.split(key, 6)
        hd = hid * heads
        bound = float(in_feats) ** -0.5
        w = jax.random.uniform(kw, (in_feats, hd), jnp.float32, -bound, bound)
        attn_l = jax.random.uniform(kl, (heads, hid), jnp.float32, -0.5, 0.5)
        attn_r = jax.random.uniform(kr, (heads, hid), jnp.float32, -0.5, 0.5)
        res_identity = (in_feats == hd)          # DGL: Identity residual if dims match
        if res_identity:
            res_w = jnp.eye(hd, dtype=jnp.float32)   # placeholder, never DMA'd
        else:
            res_w = jax.random.uniform(krw, (in_feats, hd), jnp.float32, -bound, bound)
        bias = jax.random.uniform(kb, (1, hd), jnp.float32, -0.1, 0.1)
        # Head-selection matrices: AL[h*D+d, h] = attn_l[h, d] so el = z @ AL on MXU.
        eye_h = jnp.eye(heads, dtype=jnp.float32)
        al_sel = (attn_l[:, :, None] * eye_h[:, None, :]).reshape(hd, heads)
        ar_sel = (attn_r[:, :, None] * eye_h[:, None, :]).reshape(hd, heads)
        alr_sel = jnp.concatenate([al_sel, ar_sel], axis=1)      # (hd, 2H) fused
        params.append(dict(w=w, attn_l=attn_l, attn_r=attn_r, al_sel=al_sel,
                           ar_sel=ar_sel, alr_sel=alr_sel, res_w=res_w,
                           res_identity=res_identity, bias=bias))
        in_feats = hd if AGG_MODES[i] == "flatten" else hid
    return params


def reference_forward(x, adj, params):
    """Plain-JAX dense GAT forward (same math as the kernels)."""
    adj_t = adj.astype(jnp.float32).T
    mask = adj_t > 0.0
    feats = x.astype(jnp.float32)
    att_last = None
    for i, p in enumerate(params):
        heads, hid = p["attn_l"].shape
        z = jnp.dot(feats, p["w"])
        el = jnp.dot(z, p["al_sel"])
        er = jnp.dot(z, p["ar_sel"])
        res = feats if p["res_identity"] else jnp.dot(feats, p["res_w"])
        outs, alphas = [], []
        for h in range(heads):
            sl = slice(h * hid, (h + 1) * hid)
            e = er[:, h:h + 1] + el[:, h][None, :]
            e = jnp.where(e > 0, e, NEG_SLOPE * e)
            e = jnp.where(mask, e, _NEG_INF)
            m = jnp.max(e, axis=-1, keepdims=True)
            pe = jnp.where(mask, jnp.exp(e - m), 0.0)
            s = jnp.sum(pe, axis=-1, keepdims=True)
            alpha = pe / jnp.where(s > 0, s, 1.0)
            alphas.append(alpha)
            outs.append(jnp.dot(alpha, z[:, sl]) + res[:, sl] + p["bias"][:, sl])
        if AGG_MODES[i] == "flatten":
            out = jnp.concatenate(outs, axis=-1)
        else:
            out = sum(outs[1:], outs[0]) * (1.0 / heads)
        if ACTIVATIONS[i] == "elu":
            out = jnp.where(out > 0, out, jnp.exp(out) - 1.0)
        att_last = jnp.stack(alphas, axis=0)
        feats = out
    return feats, att_last


if __name__ == "__main__":
    key = jax.random.PRNGKey(0)
    k_x, k_adj, k_p = jax.random.split(key, 3)

    N = 200          # total number of nodes (deliberately not a block multiple)
    IN_FEATS = 32
    BLOCK_N = 128    # destination-node tile; re-derive for big graphs / v7x VMEM

    x = jax.random.normal(k_x, (N, IN_FEATS), jnp.float32)
    # random sparse directed graph + self-loops (standard preprocessing for GAT)
    adj = (jax.random.uniform(k_adj, (N, N)) < 0.05).astype(jnp.float32)
    adj = jnp.maximum(adj, jnp.eye(N, dtype=jnp.float32))

    params = init_params(k_p, IN_FEATS)

    feats, att = gat_forward(x, adj, params, block_n=BLOCK_N)
    feats = jax.block_until_ready(feats)
    att = jax.block_until_ready(att)

    ref_feats, ref_att = reference_forward(x, adj, params)

    assert feats.shape == (N, HIDDEN_FEATS[-1]), feats.shape
    assert att.shape == (NUM_HEADS[-1], N, N), att.shape
    # Tolerance slightly loosened vs. exact-divide reference: the kernel uses the
    # approximate EUP reciprocal (pl.reciprocal(approx=True)) for softmax norm.
    assert jnp.allclose(feats, ref_feats, atol=5e-3, rtol=5e-3), (
        "feats mismatch, max abs diff = %e" % float(jnp.max(jnp.abs(feats - ref_feats))))
    assert jnp.allclose(att, ref_att, atol=5e-3, rtol=5e-3), (
        "attention mismatch, max abs diff = %e" % float(jnp.max(jnp.abs(att - ref_att))))

    print("KERNEL_OK")
</pallas_src>

<mosaic_0001>
module attributes {stable_mosaic.version = 11 : i64} {
  func.func @_project_kernel(%arg0: i32, %arg1: memref<256x32xf32, #tpu.memory_space<vmem>>, %arg2: memref<32x128xf32, #tpu.memory_space<vmem>>, %arg3: memref<128x8xf32, #tpu.memory_space<vmem>>, %arg4: memref<256x128xf32, #tpu.memory_space<vmem>>, %arg5: memref<256x8xf32, #tpu.memory_space<vmem>>) attributes {dimension_semantics = [#tpu.dimension_semantics<parallel>], iteration_bounds = array<i64: 1>, scalar_prefetch = 0 : i64, scratch_operands = 0 : i64, tpu.core_type = #tpu.core_type<tc>, window_params = [{transform_indices = @transform_0, window_bounds = array<i64: 256, 32>}, {pipeline_mode = #tpu.pipeline_mode<synchronous>, transform_indices = @transform_1, window_bounds = array<i64: 32, 128>}, {pipeline_mode = #tpu.pipeline_mode<synchronous>, transform_indices = @transform_2, window_bounds = array<i64: 128, 8>}, {transform_indices = @transform_3, window_bounds = array<i64: 256, 128>}, {transform_indices = @transform_4, window_bounds = array<i64: 256, 8>}]} {
    %c0 = arith.constant 0 : index
    %c0_0 = arith.constant 0 : index
    %0 = vector.load %arg1[%c0, %c0_0] : memref<256x32xf32, #tpu.memory_space<vmem>>, vector<256x32xf32>
    %c0_1 = arith.constant 0 : index
    %c0_2 = arith.constant 0 : index
    %1 = vector.load %arg2[%c0_1, %c0_2] : memref<32x128xf32, #tpu.memory_space<vmem>>, vector<32x128xf32>
    %cst = arith.constant dense<0.000000e+00> : vector<256x128xf32>
    %2 = tpu.matmul %0, %1, %cst {dimension_numbers = #tpu.dot_dimension_numbers<[1], [0], [0], [1], [0, 0, 1, 1], [], []>} : vector<256x32xf32>, vector<32x128xf32>, vector<256x128xf32> -> vector<256x128xf32>
    %c0_3 = arith.constant 0 : index
    %c0_4 = arith.constant 0 : index
    %3 = vector.load %arg4[%c0_3, %c0_4] : memref<256x128xf32, #tpu.memory_space<vmem>>, vector<256x128xf32>
    tpu.vector_store %arg4[%c0_3, %c0_4], %2 {strides = array<i32>} : memref<256x128xf32, #tpu.memory_space<vmem>>, vector<256x128xf32>,
    %c0_5 = arith.constant 0 : index
    %c0_6 = arith.constant 0 : index
    %4 = vector.load %arg3[%c0_5, %c0_6] : memref<128x8xf32, #tpu.memory_space<vmem>>, vector<128x8xf32>
    %cst_7 = arith.constant dense<0.000000e+00> : vector<256x8xf32>
    %5 = tpu.matmul %2, %4, %cst_7 {dimension_numbers = #tpu.dot_dimension_numbers<[1], [0], [0], [1], [0, 0, 1, 1], [], []>} : vector<256x128xf32>, vector<128x8xf32>, vector<256x8xf32> -> vector<256x8xf32>
    %c0_8 = arith.constant 0 : index
    %c0_9 = arith.constant 0 : index
    %6 = vector.load %arg5[%c0_8, %c0_9] : memref<256x8xf32, #tpu.memory_space<vmem>>, vector<256x8xf32>
    tpu.vector_store %arg5[%c0_8, %c0_9], %5 {strides = array<i32>} : memref<256x8xf32, #tpu.memory_space<vmem>>, vector<256x8xf32>,
    return
  }
  func.func @transform_0(%arg0: i32) -> (i32, i32) {
    %c0_i32 = arith.constant 0 : i32
    %c0_i32_0 = arith.constant 0 : i32
    return %arg0, %c0_i32 : i32, i32
  }
  func.func @transform_1(%arg0: i32) -> (i32, i32) {
    %c0_i32 = arith.constant 0 : i32
    %c0_i32_0 = arith.constant 0 : i32
    %c0_i32_1 = arith.constant 0 : i32
    return %c0_i32, %c0_i32_0 : i32, i32
  }
  func.func @transform_2(%arg0: i32) -> (i32, i32) {
    %c0_i32 = arith.constant 0 : i32
    %c0_i32_0 = arith.constant 0 : i32
    %c0_i32_1 = arith.constant 0 : i32
    return %c0_i32, %c0_i32_0 : i32, i32
  }
  func.func @transform_3(%arg0: i32) -> (i32, i32) {
    %c0_i32 = arith.constant 0 : i32
    %c0_i32_0 = arith.constant 0 : i32
    return %arg0, %c0_i32 : i32, i32
  }
  func.func @transform_4(%arg0: i32) -> (i32, i32) {
    %c0_i32 = arith.constant 0 : i32
    %c0_i32_0 = arith.constant 0 : i32
    return %arg0, %c0_i32 : i32, i32
  }
}

</mosaic_0001>

<bundles_post_ra>
// kernel: tpu_custom_call.1
= control target key start
LH: loop header
LB: loop body
LE: loop exit
PB: predicated region body
PF: predicated region fallthrough
CT: control target
= control target key end

     0   :  { %vm53_vm0 = vcmask 261120   ;;  %s1392_s0 = inlined_call_operand.vmem [shape: f32[256,32], index: 0, kind: input, shape index: {}]   ;;  %s1393_s1 = inlined_call_operand.vmem [shape: f32[32,128], index: 1, kind: input, shape index: {}]   ;;  %s1394_s2 = inlined_call_operand.vmem [shape: f32[128,8], index: 2, kind: input, shape index: {}]   ;;  %s1395_s3 = inlined_call_operand.hbm [shape: f32[256,128], index: 3, kind: output, shape index: {0}]   ;;  %s1396_s4 = inlined_call_operand.vmem [shape: f32[256,8], index: 4, kind: output, shape index: {1}]  }
   0x1   :  { %v49_v0 = vld [vmem:[%s1393_s1] sm:$0xff]  ;;  %v50_v1 = vld [vmem:[%s1393_s1 + $0x8] sm:$0xff]  ;;  %v51_v2 = vld [vmem:[%s1393_s1 + $0x10] sm:$0xff] }
   0x2   :  { %v953_v3 = vpack.c.bf16 %v50_v1, %v49_v0  ;;  %v52_v4 = vld [vmem:[%s1393_s1 + $0x18] sm:$0xff]  ;;  %v17_v5 = vld [vmem:[%s1392_s0] sm:$0xff]  ;;  %v18_v7 = vld [vmem:[%s1392_s0 + $0x8] sm:$0xff] }
   0x3   :  { %v957_v6 = vpack.c.bf16 %v52_v4, %v51_v2  ;;  %825 = vmatprep.mubr.msk.f32.mxu0 %vm53_vm0, %v17_v5  ;;  %v19_v8 = vld [vmem:[%s1392_s0 + $0x10] sm:$0xff]  ;;  %v20_v9 = vld [vmem:[%s1392_s0 + $0x18] sm:$0xff]  ;;  %v407_v10 = vld [vmem:[%s1394_s2] sm:$0xff] }
   0x4   :  { %954 = vmatprep.subr.bf16.mxu0 %v953_v3  ;;  %v408_v11 = vld [vmem:[%s1394_s2 + $0x8] sm:$0xff]  ;;  %v409_v12 = vld [vmem:[%s1394_s2 + $0x10] sm:$0xff]  ;;  %v21_v13 = vld [vmem:[%s1392_s0 + $0x20] sm:$0xff] }
   0x5   :  { %956 = vmatpush3.bf16.msra.mxu0 %v953_v3  ;;  %v961_v14 = vpack.c.bf16 %v408_v11, %v407_v10  ;;  %v410_v15 = vld [vmem:[%s1394_s2 + $0x18] sm:$0xff]  ;;  %v411_v17 = vld [vmem:[%s1394_s2 + $0x20] sm:$0xff]  ;;  %v412_v18 = vld [vmem:[%s1394_s2 + $0x28] sm:$0xff] }
   0x6   :  { %958 = vmatprep.subr.bf16.mxu0 %v957_v6  ;;  %v965_v16 = vpack.c.bf16 %v410_v15, %v409_v12  ;;  %v22_v19 = vld [vmem:[%s1392_s0 + $0x28] sm:$0xff]  ;;  %v23_v20 = vld [vmem:[%s1392_s0 + $0x30] sm:$0xff]  ;;  %v969_v21 = vpack.c.bf16 %v412_v18, %v411_v17 }
   0x7   :  { %993 = vmatprep.subr.bf16.mxu1 %v961_v14 }
   0x9   :  { %960 = vmatpush3.bf16.msra.mxu0 %v957_v6 }
   0xa   :  { %962 = vmatprep.subr.bf16.mxu0 %v961_v14 }
   0xc   :  { %826 = vmatmul.mubr.msk.f32.vlgmr.msra.gmra.mrb[0].mxu0 %vm53_vm0, %v18_v7 }
   0xd   :  { %828 = vmatprep.mubr.msk.f32.mxu0 %vm53_vm0, %v19_v8  ;;  %964 = vmatpush3.bf16.msra.mxu0 %v961_v14 }
   0xe   :  { %966 = vmatprep.subr.bf16.mxu0 %v965_v16 }
  0x10   :  { %829 = vmatmul.mubr.msk.f32.gmra.mrb[2].mxu0 %vm53_vm0, %v20_v9 }
  0x11   :  { %831 = vmatprep.mubr.msk.f32.mxu0 %vm53_vm0, %v21_v13 }
  0x12   :  { %10 = vsyncpa [#allocation3], 0  ;;  %v413_v22 = vld [vmem:[%s1394_s2 + $0x30] sm:$0xff]  ;;  %v414_v23 = vld [vmem:[%s1394_s2 + $0x38] sm:$0xff]  ;;  %1001 = vmatpush3.bf16.msra.mxu1 %v961_v14  ;;  %968 = vmatpush3.bf16.msra.mxu0 %v965_v16 }
  0x13   :  { %994 = vmatprep.subr.bf16.mxu1 %v965_v16  ;;  %v24_v24 = vld [vmem:[%s1392_s0 + $0x38] sm:$0xff]  ;;  %v25_v25 = vld [vmem:[%s1392_s0 + $0x40] sm:$0xff]  ;;  %970 = vmatprep.subr.bf16.mxu0 %v969_v21  ;;  %v973_v26 = vpack.c.bf16 %v414_v23, %v413_v22  ;;  %v416_v28 = vld [vmem:[%s1394_s2 + $0x48] sm:$0xff] }
  0x14   :  { %832 = vmatmul.mubr.msk.f32.gmra.mrb[4].mxu0 %vm53_vm0, %v22_v19  ;;  %v415_v27 = vld [vmem:[%s1394_s2 + $0x40] sm:$0xff]  ;;  %v26_v29 = vld [vmem:[%s1392_s0 + $0x48] sm:$0xff]  ;;  %v27_v30 = vld [vmem:[%s1392_s0 + $0x50] sm:$0xff] }
  0x15   :  { %834 = vmatprep.mubr.msk.f32.mxu0 %vm53_vm0, %v23_v20  ;;  %v977_v31 = vpack.c.bf16 %v416_v28, %v415_v27  ;;  %v417_v32 = vld [vmem:[%s1394_s2 + $0x50] sm:$0xff]  ;;  %v418_v33 = vld [vmem:[%s1394_s2 + $0x58] sm:$0xff]  ;;  %v29_v35 = vld [vmem:[%s1392_s0 + $0x60] sm:$0xff] }
  0x16   :  { %1002 = vmatpush3.bf16.msra.mxu1 %v965_v16  ;;  %972 = vmatpush3.bf16.msra.mxu0 %v969_v21  ;;  %v28_v34 = vld [vmem:[%s1392_s0 + $0x58] sm:$0xff]  ;;  %v981_v36 = vpack.c.bf16 %v418_v33, %v417_v32  ;;  %v419_v37 = vld [vmem:[%s1394_s2 + $0x60] sm:$0xff]  ;;  %v420_v38 = vld [vmem:[%s1394_s2 + $0x68] sm:$0xff] }
  0x17   :  { %995 = vmatprep.subr.bf16.mxu1 %v969_v21  ;;  %974 = vmatprep.subr.bf16.mxu0 %v973_v26  ;;  %v30_v39 = vld [vmem:[%s1392_s0 + $0x68] sm:$0xff]  ;;  %v31_v40 = vld [vmem:[%s1392_s0 + $0x70] sm:$0xff]  ;;  %v985_v41 = vpack.c.bf16 %v420_v38, %v419_v37  ;;  %v422_v43 = vld [vmem:[%s1394_s2 + $0x78] sm:$0xff] }
  0x18   :  { %835 = vmatmul.mubr.msk.f32.gmra.mrb[6].mxu0 %vm53_vm0, %v24_v24  ;;  %v421_v42 = vld [vmem:[%s1394_s2 + $0x70] sm:$0xff]  ;;  %v32_v44 = vld [vmem:[%s1392_s0 + $0x78] sm:$0xff]  ;;  %v33_v45 = vld [vmem:[%s1392_s0 + $0x80] sm:$0xff] }
  0x19   :  { %837 = vmatprep.mubr.msk.f32.mxu0 %vm53_vm0, %v25_v25  ;;  %v989_v46 = vpack.c.bf16 %v422_v43, %v421_v42  ;;  %v34_v47 = vld [vmem:[%s1392_s0 + $0x88] sm:$0xff]  ;;  %v35_v48 = vld [vmem:[%s1392_s0 + $0x90] sm:$0xff]  ;;  %v36_v49 = vld [vmem:[%s1392_s0 + $0x98] sm:$0xff] }
  0x1a   :  { %1003 = vmatpush3.bf16.msra.mxu1 %v969_v21  ;;  %976 = vmatpush3.bf16.msra.mxu0 %v973_v26  ;;  %v37_v50 = vld [vmem:[%s1392_s0 + $0xa0] sm:$0xff]  ;;  %v38_v51 = vld [vmem:[%s1392_s0 + $0xa8] sm:$0xff]  ;;  %v39_v52 = vld [vmem:[%s1392_s0 + $0xb0] sm:$0xff] }
  0x1b   :  { %996 = vmatprep.subr.bf16.mxu1 %v973_v26  ;;  %978 = vmatprep.subr.bf16.mxu0 %v977_v31  ;;  %v40_v53 = vld [vmem:[%s1392_s0 + $0xb8] sm:$0xff]  ;;  %v41_v54 = vld [vmem:[%s1392_s0 + $0xc0] sm:$0xff]  ;;  %v42_v55 = vld [vmem:[%s1392_s0 + $0xc8] sm:$0xff] }
  0x1c   :  { %838 = vmatmul.mubr.msk.f32.gmra.mrb[8].mxu0 %vm53_vm0, %v26_v29  ;;  %v43_v56 = vld [vmem:[%s1392_s0 + $0xd0] sm:$0xff]  ;;  %v44_v57 = vld [vmem:[%s1392_s0 + $0xd8] sm:$0xff]  ;;  %v45_v58 = vld [vmem:[%s1392_s0 + $0xe0] sm:$0xff] }
  0x1d   :  { %840 = vmatprep.mubr.msk.f32.mxu0 %vm53_vm0, %v27_v30  ;;  %v46_v59 = vld [vmem:[%s1392_s0 + $0xe8] sm:$0xff]  ;;  %v47_v60 = vld [vmem:[%s1392_s0 + $0xf0] sm:$0xff]  ;;  %v48_v61 = vld [vmem:[%s1392_s0 + $0xf8] sm:$0xff]  ;;  %s1036_s0 = smov [#allocation2]  }
  0x1e   :  { %1004 = vmatpush3.bf16.msra.mxu1 %v973_v26  ;;  %980 = vmatpush3.bf16.msra.mxu0 %v977_v31  ;;  %s686_s9 = sshll.u32 %s1036_s0, 4  ;;  %s687_s9 = int_to_ptr.vmem [resolvable:$true] %s686_s9 }
  0x1f   :  { %997 = vmatprep.subr.bf16.mxu1 %v977_v31  ;;  %982 = vmatprep.subr.bf16.mxu0 %v981_v36  ;;  %s1012_s10 = scalar_lea.vmem %s687_s9, 4096  ;;  %p1017_p1 = scmp.lt.s32.totalorder %s687_s9, %s687_s9 }
  0x20   :  { %841 = vmatmul.mubr.msk.f32.gmra.mrb[10].mxu0 %vm53_vm0, %v28_v34  ;;  %p1013_p0 = scmp.ne.s32.totalorder %s687_s9, %s1012_s10  ;;  %p1018_p2 = scmp.lt.s32.totalorder %s1012_s10, %s1012_s10 }
  0x21   :  { %843 = vmatprep.mubr.msk.f32.mxu0 %vm53_vm0, %v29_v35 }
  0x22   :  { %1005 = vmatpush3.bf16.msra.mxu1 %v977_v31  ;;  %984 = vmatpush3.bf16.msra.mxu0 %v981_v36  ;;  %p1019_p3 = por %p1018_p2, %p1017_p1 }
  0x23   :  { %998 = vmatprep.subr.bf16.mxu1 %v981_v36  ;;  %986 = vmatprep.subr.bf16.mxu0 %v985_v41 }
  0x24   :  { %844 = vmatmul.mubr.msk.f32.gmra.mrb[12].mxu0 %vm53_vm0, %v30_v39  ;;  %p1020_p4 = pnand %p1019_p3, %p1013_p0 }
  0x25   :  { %846 = vmatprep.mubr.msk.f32.mxu0 %vm53_vm0, %v31_v40 }
  0x26   :  { %1006 = vmatpush3.bf16.msra.mxu1 %v981_v36  ;;  %988 = vmatpush3.bf16.msra.mxu0 %v985_v41 }
  0x27   :  { %999 = vmatprep.subr.bf16.mxu1 %v985_v41  ;;  %990 = vmatprep.subr.bf16.mxu0 %v989_v46 }
  0x28   :  { %847 = vmatmul.mubr.msk.f32.gmra.mrb[14].mxu0 %vm53_vm0, %v32_v44 }
  0x29   :  { %849 = vmatprep.mubr.msk.f32.mxu0 %vm53_vm0, %v33_v45 }
  0x2a   :  { %1007 = vmatpush3.bf16.msra.mxu1 %v985_v41  ;;  %992 = vmatpush3.bf16.msra.mxu0 %v989_v46 }
  0x2b   :  { %1000 = vmatprep.subr.bf16.mxu1 %v989_v46 }
  0x2c   :  { %850 = vmatmul.mubr.msk.f32.gmra.mrb[16].mxu0 %vm53_vm0, %v34_v47 }
  0x2d   :  { %852 = vmatprep.mubr.msk.f32.mxu0 %vm53_vm0, %v35_v48 }
  0x2e   :  { %1008 = vmatpush3.bf16.msra.mxu1 %v989_v46 }
  0x30   :  { %853 = vmatmul.mubr.msk.f32.gmra.mrb[18].mxu0 %vm53_vm0, %v36_v49 }
  0x31   :  { %855 = vmatprep.mubr.msk.f32.mxu0 %vm53_vm0, %v37_v50 }
  0x34   :  { %856 = vmatmul.mubr.msk.f32.gmra.mrb[20].mxu0 %vm53_vm0, %v38_v51 }
  0x35   :  { %858 = vmatprep.mubr.msk.f32.mxu0 %vm53_vm0, %v39_v52 }
  0x38   :  { %859 = vmatmul.mubr.msk.f32.gmra.mrb[22].mxu0 %vm53_vm0, %v40_v53 }
  0x39   :  { %861 = vmatprep.mubr.msk.f32.mxu0 %vm53_vm0, %v41_v54 }
  0x3c   :  { %862 = vmatmul.mubr.msk.f32.gmra.mrb[24].mxu0 %vm53_vm0, %v42_v55 }
  0x3d   :  { %864 = vmatprep.mubr.msk.f32.mxu0 %vm53_vm0, %v43_v56 }
  0x40   :  { %865 = vmatmul.mubr.msk.f32.gmra.mrb[26].mxu0 %vm53_vm0, %v44_v57 }
  0x41   :  { %867 = vmatprep.mubr.msk.f32.mxu0 %vm53_vm0, %v45_v58 }
  0x44   :  { %868 = vmatmul.mubr.msk.f32.gmra.mrb[28].mxu0 %vm53_vm0, %v46_v59 }
  0x45   :  { %870 = vmatprep.mubr.msk.f32.mxu0 %vm53_vm0, %v47_v60 }
  0x48   :  { %871 = vmatmul.mubr.msk.f32.gmra.mrb[30].mxu0 %vm53_vm0, %v48_v61 }
  0xdf   :  { %v827_v62 = vpop.f32.mrb[0].mxu0 }
  0xe0   :  { %376 = vst [vmem:[#allocation2 + $0x8] sm:$0xff] %v827_v62  ;;  %v216_v63 = vpop.f32.mrb[1].mxu0 }
  0xe1   :  { %375 = vst [vmem:[#allocation2] sm:$0xff] %v216_v63  ;;  %905 = vmatprep.mubr.f32.mxu0 %v216_v63 }
  0xe2   :  { %906 = vmatmul.mubr.f32.vlgmr.msra.gmra.mrb[32].mxu0 %v827_v62 }
  0xe3   :  { %v830_v0 = vpop.f32.mrb[2].mxu0 }
  0xe4   :  { %378 = vst [vmem:[#allocation2 + $0x18] sm:$0xff] %v830_v0  ;;  %v226_v1 = vpop.f32.mrb[3].mxu0 }
  0xe5   :  { %377 = vst [vmem:[#allocation2 + $0x10] sm:$0xff] %v226_v1  ;;  %908 = vmatprep.mubr.f32.mxu0 %v226_v1 }
  0xe6   :  { %909 = vmatmul.mubr.f32.gmra.mrb[34].mxu0 %v830_v0 }
  0xe7   :  { %v833_v2 = vpop.f32.mrb[4].mxu0 }
  0xe8   :  { %380 = vst [vmem:[#allocation2 + $0x28] sm:$0xff] %v833_v2  ;;  %v236_v3 = vpop.f32.mrb[5].mxu0 }
  0xe9   :  { %379 = vst [vmem:[#allocation2 + $0x20] sm:$0xff] %v236_v3  ;;  %911 = vmatprep.mubr.f32.mxu0 %v236_v3 }
  0xea   :  { %912 = vmatmul.mubr.f32.gmra.mrb[36].mxu0 %v833_v2 }
  0xeb   :  { %v836_v4 = vpop.f32.mrb[6].mxu0 }
  0xec   :  { %382 = vst [vmem:[#allocation2 + $0x38] sm:$0xff] %v836_v4  ;;  %v246_v5 = vpop.f32.mrb[7].mxu0 }
  0xed   :  { %381 = vst [vmem:[#allocation2 + $0x30] sm:$0xff] %v246_v5  ;;  %914 = vmatprep.mubr.f32.mxu1 %v246_v5 }
  0xee   :  { %915 = vmatmul.mubr.f32.vlgmr.msra.gmra.mrb[0].mxu1 %v836_v4 }
  0xef   :  { %v839_v6 = vpop.f32.mrb[8].mxu0 }
  0xf0   :  { %384 = vst [vmem:[#allocation2 + $0x48] sm:$0xff] %v839_v6  ;;  %v256_v7 = vpop.f32.mrb[9].mxu0 }
  0xf1   :  { %383 = vst [vmem:[#allocation2 + $0x40] sm:$0xff] %v256_v7  ;;  %917 = vmatprep.mubr.f32.mxu1 %v256_v7 }
  0xf2   :  { %918 = vmatmul.mubr.f32.gmra.mrb[2].mxu1 %v839_v6 }
  0xf3   :  { %v842_v8 = vpop.f32.mrb[10].mxu0 }
  0xf4   :  { %386 = vst [vmem:[#allocation2 + $0x58] sm:$0xff] %v842_v8  ;;  %v266_v9 = vpop.f32.mrb[11].mxu0 }
  0xf5   :  { %385 = vst [vmem:[#allocation2 + $0x50] sm:$0xff] %v266_v9  ;;  %920 = vmatprep.mubr.f32.mxu1 %v266_v9 }
  0xf6   :  { %921 = vmatmul.mubr.f32.gmra.mrb[4].mxu1 %v842_v8 }
  0xf7   :  { %v845_v10 = vpop.f32.mrb[12].mxu0 }
  0xf8   :  { %388 = vst [vmem:[#allocation2 + $0x68] sm:$0xff] %v845_v10  ;;  %v276_v11 = vpop.f32.mrb[13].mxu0 }
  0xf9   :  { %387 = vst [vmem:[#allocation2 + $0x60] sm:$0xff] %v276_v11  ;;  %923 = vmatprep.mubr.f32.mxu1 %v276_v11 }
  0xfa   :  { %924 = vmatmul.mubr.f32.gmra.mrb[6].mxu1 %v845_v10 }
  0xfb   :  { %v848_v12 = vpop.f32.mrb[14].mxu0 }
  0xfc   :  { %390 = vst [vmem:[#allocation2 + $0x78] sm:$0xff] %v848_v12  ;;  %v286_v13 = vpop.f32.mrb[15].mxu0 }
  0xfd   :  { %389 = vst [vmem:[#allocation2 + $0x70] sm:$0xff] %v286_v13  ;;  %926 = vmatprep.mubr.f32.mxu1 %v286_v13 }
  0xfe   :  { %927 = vmatmul.mubr.f32.gmra.mrb[8].mxu1 %v848_v12 }
  0xff   :  { %v851_v14 = vpop.f32.mrb[16].mxu0 }
 0x100   :  { %392 = vst [vmem:[#allocation2 + $0x88] sm:$0xff] %v851_v14  ;;  %v296_v15 = vpop.f32.mrb[17].mxu0 }
 0x101   :  { %391 = vst [vmem:[#allocation2 + $0x80] sm:$0xff] %v296_v15  ;;  %929 = vmatprep.mubr.f32.mxu1 %v296_v15 }
 0x102   :  { %930 = vmatmul.mubr.f32.gmra.mrb[10].mxu1 %v851_v14 }
 0x103   :  { %v854_v16 = vpop.f32.mrb[18].mxu0 }
 0x104   :  { %394 = vst [vmem:[#allocation2 + $0x98] sm:$0xff] %v854_v16  ;;  %v306_v17 = vpop.f32.mrb[19].mxu0 }
 0x105   :  { %393 = vst [vmem:[#allocation2 + $0x90] sm:$0xff] %v306_v17  ;;  %932 = vmatprep.mubr.f32.mxu1 %v306_v17 }
 0x106   :  { %933 = vmatmul.mubr.f32.gmra.mrb[12].mxu1 %v854_v16 }
 0x107   :  { %v857_v18 = vpop.f32.mrb[20].mxu0 }
 0x108   :  { %396 = vst [vmem:[#allocation2 + $0xa8] sm:$0xff] %v857_v18  ;;  %v316_v19 = vpop.f32.mrb[21].mxu0 }
 0x109   :  { %395 = vst [vmem:[#allocation2 + $0xa0] sm:$0xff] %v316_v19  ;;  %935 = vmatprep.mubr.f32.mxu1 %v316_v19 }
 0x10a   :  { %936 = vmatmul.mubr.f32.gmra.mrb[14].mxu1 %v857_v18 }
 0x10b   :  { %v860_v20 = vpop.f32.mrb[22].mxu0 }
 0x10c   :  { %398 = vst [vmem:[#allocation2 + $0xb8] sm:$0xff] %v860_v20  ;;  %v326_v21 = vpop.f32.mrb[23].mxu0 }
 0x10d   :  { %397 = vst [vmem:[#allocation2 + $0xb0] sm:$0xff] %v326_v21  ;;  %938 = vmatprep.mubr.f32.mxu1 %v326_v21 }
 0x10e   :  { %939 = vmatmul.mubr.f32.gmra.mrb[16].mxu1 %v860_v20 }
 0x10f   :  { %v863_v22 = vpop.f32.mrb[24].mxu0 }
 0x110   :  { %400 = vst [vmem:[#allocation2 + $0xc8] sm:$0xff] %v863_v22  ;;  %v336_v23 = vpop.f32.mrb[25].mxu0 }
 0x111   :  { %399 = vst [vmem:[#allocation2 + $0xc0] sm:$0xff] %v336_v23  ;;  %941 = vmatprep.mubr.f32.mxu1 %v336_v23 }
 0x112   :  { %942 = vmatmul.mubr.f32.gmra.mrb[18].mxu1 %v863_v22 }
 0x113   :  { %v866_v24 = vpop.f32.mrb[26].mxu0 }
 0x114   :  { %402 = vst [vmem:[#allocation2 + $0xd8] sm:$0xff] %v866_v24  ;;  %v346_v25 = vpop.f32.mrb[27].mxu0 }
 0x115   :  { %401 = vst [vmem:[#allocation2 + $0xd0] sm:$0xff] %v346_v25  ;;  %944 = vmatprep.mubr.f32.mxu1 %v346_v25 }
 0x116   :  { %945 = vmatmul.mubr.f32.gmra.mrb[20].mxu1 %v866_v24 }
 0x117   :  { %v869_v26 = vpop.f32.mrb[28].mxu0 }
 0x118   :  { %404 = vst [vmem:[#allocation2 + $0xe8] sm:$0xff] %v869_v26  ;;  %v356_v27 = vpop.f32.mrb[29].mxu0 }
 0x119   :  { %403 = vst [vmem:[#allocation2 + $0xe0] sm:$0xff] %v356_v27  ;;  %947 = vmatprep.mubr.f32.mxu1 %v356_v27 }
 0x11a   :  { %948 = vmatmul.mubr.f32.gmra.mrb[22].mxu1 %v869_v26 }
 0x11b   :  { %v872_v28 = vpop.f32.mrb[30].mxu0 }
 0x11c   :  { %406 = vst [vmem:[#allocation2 + $0xf8] sm:$0xff] %v872_v28  ;;  %v366_v29 = vpop.f32.mrb[31].mxu0 }
 0x11d   :  { %405 = vst [vmem:[#allocation2 + $0xf0] sm:$0xff] %v366_v29  ;;  %950 = vmatprep.mubr.f32.mxu1 %v366_v29 }
 0x11e   :  { %951 = vmatmul.mubr.f32.gmra.mrb[24].mxu1 %v872_v28 }
 0x11f   :  { %1023 = shalt.err (!%p1020_p4)
}
 0x120   :  { %s1024_s13 = scalar_lea.hbm %s1395_s3, 4096 }
 0x121   :  { %p1025_p5 = scmp.ne.s32.totalorder %s1395_s3, %s1024_s13  ;;  %p1028_p6 = scmp.lt.u32.totalorder %s1024_s13, %s1395_s3 }
 0x123   :  { %p1030_p7 = pnand %p1028_p6, %p1025_p5 }
 0x125   :  { %1033 = shalt.err (!%p1030_p7)
}
 0x126   :  { %s1037_s18 = smov 128   ;;  %s1038_s19 = smov 8   ;;  %vm648_vm1 = vcmask 64512  }
 0x127   :  { %692 = dma.vmem_to_hbm [thread:$0]  %s687_s9, 4096, %s1395_s3, [#allocation3], %s1037_s18, %s1037_s18, %s1038_s19  }
 0x1b5   :  { %v907_v30 = vpop.f32.mrb[32].mxu0 }
 0x1b6   :  { %650 = vst.msk [vmem:[%s1396_s4 + $0x8] sm:$0xff] %vm648_vm1, %v907_v30  ;;  %v489_v31 = vpop.f32.mrb[33].mxu0 }
 0x1b7   :  { %649 = vst.msk [vmem:[%s1396_s4] sm:$0xff] %vm648_vm1, %v489_v31 }
 0x1b9   :  { %v910_v32 = vpop.f32.mrb[34].mxu0 }
 0x1ba   :  { %652 = vst.msk [vmem:[%s1396_s4 + $0x18] sm:$0xff] %vm648_vm1, %v910_v32  ;;  %v499_v33 = vpop.f32.mrb[35].mxu0 }
 0x1bb   :  { %651 = vst.msk [vmem:[%s1396_s4 + $0x10] sm:$0xff] %vm648_vm1, %v499_v33 }
 0x1bd   :  { %v913_v34 = vpop.f32.mrb[36].mxu0 }
 0x1be   :  { %654 = vst.msk [vmem:[%s1396_s4 + $0x28] sm:$0xff] %vm648_vm1, %v913_v34  ;;  %v509_v35 = vpop.f32.mrb[37].mxu0 }
 0x1bf   :  { %653 = vst.msk [vmem:[%s1396_s4 + $0x20] sm:$0xff] %vm648_vm1, %v509_v35 }
 0x1c1   :  { %v916_v36 = vpop.f32.mrb[0].mxu1 }
 0x1c2   :  { %656 = vst.msk [vmem:[%s1396_s4 + $0x38] sm:$0xff] %vm648_vm1, %v916_v36  ;;  %v519_v37 = vpop.f32.mrb[1].mxu1 }
 0x1c3   :  { %655 = vst.msk [vmem:[%s1396_s4 + $0x30] sm:$0xff] %vm648_vm1, %v519_v37 }
 0x1c5   :  { %v919_v38 = vpop.f32.mrb[2].mxu1 }
 0x1c6   :  { %658 = vst.msk [vmem:[%s1396_s4 + $0x48] sm:$0xff] %vm648_vm1, %v919_v38  ;;  %v529_v39 = vpop.f32.mrb[3].mxu1 }
 0x1c7   :  { %657 = vst.msk [vmem:[%s1396_s4 + $0x40] sm:$0xff] %vm648_vm1, %v529_v39 }
 0x1c9   :  { %v922_v40 = vpop.f32.mrb[4].mxu1 }
 0x1ca   :  { %660 = vst.msk [vmem:[%s1396_s4 + $0x58] sm:$0xff] %vm648_vm1, %v922_v40  ;;  %v539_v41 = vpop.f32.mrb[5].mxu1 }
 0x1cb   :  { %659 = vst.msk [vmem:[%s1396_s4 + $0x50] sm:$0xff] %vm648_vm1, %v539_v41 }
 0x1cd   :  { %v925_v42 = vpop.f32.mrb[6].mxu1 }
 0x1ce   :  { %662 = vst.msk [vmem:[%s1396_s4 + $0x68] sm:$0xff] %vm648_vm1, %v925_v42  ;;  %v549_v43 = vpop.f32.mrb[7].mxu1 }
 0x1cf   :  { %661 = vst.msk [vmem:[%s1396_s4 + $0x60] sm:$0xff] %vm648_vm1, %v549_v43 }
 0x1d1   :  { %v928_v44 = vpop.f32.mrb[8].mxu1 }
 0x1d2   :  { %664 = vst.msk [vmem:[%s1396_s4 + $0x78] sm:$0xff] %vm648_vm1, %v928_v44  ;;  %v559_v45 = vpop.f32.mrb[9].mxu1 }
 0x1d3   :  { %663 = vst.msk [vmem:[%s1396_s4 + $0x70] sm:$0xff] %vm648_vm1, %v559_v45 }
 0x1d5   :  { %v931_v46 = vpop.f32.mrb[10].mxu1 }
 0x1d6   :  { %666 = vst.msk [vmem:[%s1396_s4 + $0x88] sm:$0xff] %vm648_vm1, %v931_v46  ;;  %v569_v47 = vpop.f32.mrb[11].mxu1 }
 0x1d7   :  { %665 = vst.msk [vmem:[%s1396_s4 + $0x80] sm:$0xff] %vm648_vm1, %v569_v47 }
 0x1d9   :  { %v934_v48 = vpop.f32.mrb[12].mxu1 }
 0x1da   :  { %668 = vst.msk [vmem:[%s1396_s4 + $0x98] sm:$0xff] %vm648_vm1, %v934_v48  ;;  %v579_v49 = vpop.f32.mrb[13].mxu1 }
 0x1db   :  { %667 = vst.msk [vmem:[%s1396_s4 + $0x90] sm:$0xff] %vm648_vm1, %v579_v49 }
 0x1dd   :  { %v937_v50 = vpop.f32.mrb[14].mxu1 }
 0x1de   :  { %670 = vst.msk [vmem:[%s1396_s4 + $0xa8] sm:$0xff] %vm648_vm1, %v937_v50  ;;  %v589_v51 = vpop.f32.mrb[15].mxu1 }
 0x1df   :  { %669 = vst.msk [vmem:[%s1396_s4 + $0xa0] sm:$0xff] %vm648_vm1, %v589_v51 }
 0x1e1   :  { %v940_v52 = vpop.f32.mrb[16].mxu1 }
 0x1e2   :  { %672 = vst.msk [vmem:[%s1396_s4 + $0xb8] sm:$0xff] %vm648_vm1, %v940_v52  ;;  %v599_v53 = vpop.f32.mrb[17].mxu1 }
 0x1e3   :  { %671 = vst.msk [vmem:[%s1396_s4 + $0xb0] sm:$0xff] %vm648_vm1, %v599_v53 }
 0x1e5   :  { %v943_v54 = vpop.f32.mrb[18].mxu1 }
 0x1e6   :  { %674 = vst.msk [vmem:[%s1396_s4 + $0xc8] sm:$0xff] %vm648_vm1, %v943_v54  ;;  %v609_v55 = vpop.f32.mrb[19].mxu1 }
 0x1e7   :  { %673 = vst.msk [vmem:[%s1396_s4 + $0xc0] sm:$0xff] %vm648_vm1, %v609_v55 }
 0x1e9   :  { %v946_v56 = vpop.f32.mrb[20].mxu1 }
 0x1ea   :  { %676 = vst.msk [vmem:[%s1396_s4 + $0xd8] sm:$0xff] %vm648_vm1, %v946_v56  ;;  %v619_v57 = vpop.f32.mrb[21].mxu1 }
 0x1eb   :  { %675 = vst.msk [vmem:[%s1396_s4 + $0xd0] sm:$0xff] %vm648_vm1, %v619_v57 }
 0x1ed   :  { %v949_v58 = vpop.f32.mrb[22].mxu1 }
 0x1ee   :  { %678 = vst.msk [vmem:[%s1396_s4 + $0xe8] sm:$0xff] %vm648_vm1, %v949_v58  ;;  %v629_v59 = vpop.f32.mrb[23].mxu1 }
 0x1ef   :  { %677 = vst.msk [vmem:[%s1396_s4 + $0xe0] sm:$0xff] %vm648_vm1, %v629_v59 }
 0x1f1   :  { %v952_v60 = vpop.f32.mrb[24].mxu1 }
 0x1f2   :  { %680 = vst.msk [vmem:[%s1396_s4 + $0xf8] sm:$0xff] %vm648_vm1, %v952_v60  ;;  %v639_v61 = vpop.f32.mrb[25].mxu1 }
 0x1f3   :  { %679 = vst.msk [vmem:[%s1396_s4 + $0xf0] sm:$0xff] %vm648_vm1, %v639_v61 }
 0x1f4   :  { %1034 = dma.done.wait [#allocation3], 4096  }
 0x1f5   :  { %1035 = vsyncadd [#allocation3], 4294963200 }
 0x1f6   :  { %700 = vsyncpa [#allocation3], 1 }

</bundles_post_ra>
